<compile_context>
chip_gen: v7x
topology: tpu7x:2x2x1
jax: 0.10.0
libtpu: 0.0.40
codegen_flags: <defaults>
</compile_context>

<pallas_src>
import jax
import jax.numpy as jnp
from jax import lax
from jax.experimental import pallas as pl
from jax.experimental.pallas import tpu as pltpu

_Y_LANES = 128  # lane-dense width for the argmax output block


def arcface_mlp_kernel(x_ref, w1t_ref, b1_ref, wnt_ref,
                       emb_ref, cos_ref, prob_ref, ypred_ref):
    # ---- fc1: x @ W1^T + b1 (bf16 MXU operands, f32 accumulate) ----
    x = x_ref[...].astype(jnp.bfloat16)                     # (bt, D_in)
    h = jnp.dot(x, w1t_ref[...],
                preferred_element_type=jnp.float32) + b1_ref[...]
    emb_ref[...] = h                                        # (bt, H) f32

    # ---- row inverse norm of h (rsqrt -> EUP). torch F.normalize clamps the
    #      norm at 1e-12, i.e. max(sqrt(sq), 1e-12) == sqrt(max(sq, 1e-24)).
    sq = jnp.sum(h * h, axis=1, keepdims=True)              # (bt, 1)
    inv_n = lax.rsqrt(jnp.maximum(sq, jnp.float32(1e-24)))

    # ---- cosine = (h @ w_norm_T) scaled per-row (normalize AFTER matmul) ----
    cos = jnp.dot(h.astype(jnp.bfloat16), wnt_ref[...],
                  preferred_element_type=jnp.float32) * inv_n
    cos_ref[...] = cos                                      # (bt, C)

    # ---- softmax over classes (numerically stable); exact reciprocal ----
    m = jnp.max(cos, axis=1, keepdims=True)
    e = jnp.exp(cos - m)
    denom = jnp.sum(e, axis=1, keepdims=True)
    prob_ref[...] = e * pl.reciprocal(denom)

    # ---- argmax (first maximal index), lane-dense output block ----
    C = cos.shape[1]
    col = lax.broadcasted_iota(jnp.int32, cos.shape, 1)
    amax = jnp.min(jnp.where(cos == m, col, jnp.int32(C)), axis=1, keepdims=True)
    ypred_ref[...] = jnp.broadcast_to(amax, ypred_ref.shape)


def prepare_arcface_params(fc1_w, fc1_b, weight):
    """One-time parameter preprocessing (do NOT call per forward).

    fc1_w: (H, D_in), fc1_b: (H,), weight: (C, H)
    returns w1t (D_in, H) bf16, b1 (1, H) f32, w_norm_T (H, C) bf16
    """
    eps = jnp.float32(1e-12)
    fc1_w = jnp.asarray(fc1_w, jnp.float32)
    weight = jnp.asarray(weight, jnp.float32)
    w1t = fc1_w.T.astype(jnp.bfloat16)
    b1 = jnp.asarray(fc1_b, jnp.float32).reshape(1, -1)
    wn = weight / jnp.maximum(
        jnp.sqrt(jnp.sum(weight * weight, axis=1, keepdims=True)), eps)
    return w1t, b1, wn.T.astype(jnp.bfloat16)


def _round_up(v, m):
    return -(-v // m) * m


def arcface_mlp_forward(x, w1t, b1, w_norm_T, *, b_tile=512):
    """x: (B, D_in) f32; params from prepare_arcface_params."""
    B, D_in = x.shape
    H = w1t.shape[1]
    C = w_norm_T.shape[1]

    # Tile choice: sublane-aligned (multiple of 8), large enough to amortize
    # the ~0.35us per-grid-step overhead, and aiming for >=2 grid steps so the
    # "parallel" batch axis can split across v7x's two TensorCores.
    bt = max(8, min(int(b_tile), _round_up(pl.cdiv(B, 2), 8)))
    n_b = pl.cdiv(B, bt)
    B_pad = n_b * bt
    if B_pad != B:
        x = jnp.pad(x, ((0, B_pad - B), (0, 0)))

    # TODO(synk): for production ArcFace class counts (C ~ 1e4-1e5) add a
    # C-tiled grid axis (last, "arbitrary") with an online/two-pass softmax so
    # the (H, C) prototype block is streamed instead of kept resident.
    out_shape = (
        jax.ShapeDtypeStruct((B_pad, H), jnp.float32),        # face_embedd
        jax.ShapeDtypeStruct((B_pad, C), jnp.float32),        # cosine
        jax.ShapeDtypeStruct((B_pad, C), jnp.float32),        # prob_pred
        jax.ShapeDtypeStruct((B_pad, _Y_LANES), jnp.int32),   # y_pred (lane-dense)
    )
    grid_spec = pltpu.PrefetchScalarGridSpec(
        num_scalar_prefetch=0,
        grid=(n_b,),
        in_specs=[
            pl.BlockSpec((bt, D_in), lambda i: (i, 0)),       # x tile
            pl.BlockSpec((D_in, H), lambda i: (0, 0),         # fc1 weight
                         pipeline_mode=pl.Buffered(1)),       #   (resident, 1-buf)
            pl.BlockSpec((1, H), lambda i: (0, 0)),           # bias (tiny, resident)
            pl.BlockSpec((H, C), lambda i: (0, 0),            # prototypes
                         pipeline_mode=pl.Buffered(1)),       #   (resident, 1-buf)
        ],
        out_specs=[
            pl.BlockSpec((bt, H), lambda i: (i, 0)),
            pl.BlockSpec((bt, C), lambda i: (i, 0)),
            pl.BlockSpec((bt, C), lambda i: (i, 0)),
            pl.BlockSpec((bt, _Y_LANES), lambda i: (i, 0)),
        ],
    )

    # VMEM budget: single-buffered weights + double-buffered streamed tiles.
    vmem_est = (
        w1t.size * w1t.dtype.itemsize
        + w_norm_T.size * w_norm_T.dtype.itemsize
        + 2 * b1.size * 4
        + 2 * bt * D_in * 4          # x
        + 2 * bt * H * 4             # face_embedd
        + 2 * 2 * bt * C * 4         # cosine + prob
        + 2 * bt * _Y_LANES * 4      # y_pred block
    )
    vmem_limit = int(min(max(2 * vmem_est, 32 * 1024 * 1024), 56 * 1024 * 1024))

    cost = pl.CostEstimate(
        flops=2 * B_pad * D_in * H + 2 * B_pad * H * C + 8 * B_pad * C,
        transcendentals=B_pad * C + 2 * B_pad,               # exp + rsqrt + recip
        bytes_accessed=(B_pad * D_in * 4
                        + w1t.size * w1t.dtype.itemsize
                        + b1.size * 4
                        + w_norm_T.size * w_norm_T.dtype.itemsize
                        + B_pad * H * 4
                        + 2 * B_pad * C * 4
                        + B_pad * _Y_LANES * 4),
    )

    fn = pl.pallas_call(
        arcface_mlp_kernel,
        out_shape=out_shape,
        grid_spec=grid_spec,
        compiler_params=pltpu.CompilerParams(
            dimension_semantics=("parallel",),
            vmem_limit_bytes=vmem_limit),
        cost_estimate=cost,
    )
    emb, cosine, prob, y = fn(x, w1t, b1, w_norm_T)
    return emb[:B], cosine[:B], prob[:B], y[:B, 0]


def _reference(x, fc1_w, fc1_b, weight):
    h = x @ fc1_w.T + fc1_b
    eps = 1e-12
    hn = h / jnp.maximum(jnp.linalg.norm(h, axis=1, keepdims=True), eps)
    wn = weight / jnp.maximum(jnp.linalg.norm(weight, axis=1, keepdims=True), eps)
    cos = hn @ wn.T
    prob = jax.nn.softmax(cos, axis=1)
    y = jnp.argmax(cos, axis=1).astype(jnp.int32)
    return h, cos, prob, y


if __name__ == "__main__":
    # small but module-consistent shapes: face_embed='arcface' -> D_in=512, H=512
    B, D_in, H, C = 8, 512, 512, 128

    key = jax.random.PRNGKey(0)
    kx, kw1, kb1, kw = jax.random.split(key, 4)
    x = jax.random.normal(kx, (B, D_in), dtype=jnp.float32)
    fc1_w = jax.random.normal(kw1, (H, D_in), dtype=jnp.float32) * 0.02   # nn.Linear weight
    fc1_b = jax.random.normal(kb1, (H,), dtype=jnp.float32) * 0.02        # nn.Linear bias
    weight = jax.random.normal(kw, (C, H), dtype=jnp.float32)             # ArcFace prototypes

    # one-time preprocessing (hoisted out of the forward path)
    w1t, b1, w_norm_T = prepare_arcface_params(fc1_w, fc1_b, weight)
    w1t, b1, w_norm_T = jax.block_until_ready((w1t, b1, w_norm_T))

    emb, cosine, prob, y_pred = arcface_mlp_forward(x, w1t, b1, w_norm_T)
    jax.block_until_ready((emb, cosine, prob, y_pred))

    # sanity check against pure-f32 JAX reference; tolerances relaxed because
    # the kernel runs the MXU with bf16 operands (f32 accumulation).
    r_emb, r_cos, r_prob, r_y = _reference(x, fc1_w, fc1_b, weight)
    assert jnp.allclose(emb, r_emb, atol=2e-2, rtol=2e-2)
    assert jnp.allclose(cosine, r_cos, atol=5e-3, rtol=5e-3)
    assert jnp.allclose(prob, r_prob, atol=1e-3, rtol=1e-3)
    # argmax must be self-consistent with the kernel's own cosine; vs the f32
    # reference a flip is only tolerated when the f32 top-2 gap is below
    # bf16-level noise.
    assert jnp.array_equal(y_pred, jnp.argmax(cosine, axis=1).astype(jnp.int32))
    rows = jnp.arange(B)
    gap = r_cos[rows, r_y] - r_cos[rows, y_pred]
    assert jnp.all((y_pred == r_y) | (gap < 5e-3))

    print("KERNEL_OK")
</pallas_src>

<mosaic_0001>
module attributes {stable_mosaic.version = 11 : i64} {
  func.func @arcface_mlp_kernel(%arg0: i32, %arg1: memref<8x512xf32, #tpu.memory_space<vmem>>, %arg2: memref<512x512xbf16, #tpu.memory_space<vmem>>, %arg3: memref<1x512xf32, #tpu.memory_space<vmem>>, %arg4: memref<512x128xbf16, #tpu.memory_space<vmem>>, %arg5: memref<8x512xf32, #tpu.memory_space<vmem>>, %arg6: memref<8x128xf32, #tpu.memory_space<vmem>>, %arg7: memref<8x128xf32, #tpu.memory_space<vmem>>, %arg8: memref<8x128xi32, #tpu.memory_space<vmem>>) attributes {dimension_semantics = [#tpu.dimension_semantics<parallel>], iteration_bounds = array<i64: 1>, scalar_prefetch = 0 : i64, scratch_operands = 0 : i64, tpu.core_type = #tpu.core_type<tc>, window_params = [{transform_indices = @transform_0, window_bounds = array<i64: 8, 512>}, {pipeline_mode = #tpu.pipeline_mode<synchronous>, transform_indices = @transform_1, window_bounds = array<i64: 512, 512>}, {pipeline_mode = #tpu.pipeline_mode<synchronous>, transform_indices = @transform_2, window_bounds = array<i64: 1, 512>}, {pipeline_mode = #tpu.pipeline_mode<synchronous>, transform_indices = @transform_3, window_bounds = array<i64: 512, 128>}, {transform_indices = @transform_4, window_bounds = array<i64: 8, 512>}, {transform_indices = @transform_5, window_bounds = array<i64: 8, 128>}, {transform_indices = @transform_6, window_bounds = array<i64: 8, 128>}, {transform_indices = @transform_7, window_bounds = array<i64: 8, 128>}]} {
    %c0 = arith.constant 0 : index
    %c0_0 = arith.constant 0 : index
    %0 = vector.load %arg1[%c0, %c0_0] : memref<8x512xf32, #tpu.memory_space<vmem>>, vector<8x512xf32>
    %1 = arith.truncf %0 : vector<8x512xf32> to vector<8x512xbf16>
    %c0_1 = arith.constant 0 : index
    %c0_2 = arith.constant 0 : index
    %2 = vector.load %arg2[%c0_1, %c0_2] : memref<512x512xbf16, #tpu.memory_space<vmem>>, vector<512x512xbf16>
    %cst = arith.constant dense<0.000000e+00> : vector<8x512xf32>
    %3 = tpu.matmul %1, %2, %cst {dimension_numbers = #tpu.dot_dimension_numbers<[1], [0], [0], [1], [0, 0, 1, 1], [], []>} : vector<8x512xbf16>, vector<512x512xbf16>, vector<8x512xf32> -> vector<8x512xf32>
    %c0_3 = arith.constant 0 : index
    %c0_4 = arith.constant 0 : index
    %4 = vector.load %arg3[%c0_3, %c0_4] : memref<1x512xf32, #tpu.memory_space<vmem>>, vector<1x512xf32>
    %5 = vector.broadcast %4 : vector<1x512xf32> to vector<8x512xf32>
    %6 = arith.addf %3, %5 : vector<8x512xf32>
    %c0_5 = arith.constant 0 : index
    %c0_6 = arith.constant 0 : index
    %7 = vector.load %arg5[%c0_5, %c0_6] : memref<8x512xf32, #tpu.memory_space<vmem>>, vector<8x512xf32>
    tpu.vector_store %arg5[%c0_5, %c0_6], %6 {strides = array<i32>} : memref<8x512xf32, #tpu.memory_space<vmem>>, vector<8x512xf32>,
    %8 = arith.mulf %6, %6 : vector<8x512xf32>
    %cst_7 = arith.constant dense<0.000000e+00> : vector<8xf32>
    %9 = vector.multi_reduction <add>, %8, %cst_7 [1] : vector<8x512xf32> to vector<8xf32>
    %10 = vector.shape_cast %9 : vector<8xf32> to vector<8x1xf32>
    %cst_8 = arith.constant 1.000000e-24 : f32
    %11 = vector.broadcast %cst_8 : f32 to vector<8x1xf32>
    %12 = arith.maximumf %10, %11 : vector<8x1xf32>
    %13 = math.rsqrt %12 : vector<8x1xf32>
    %14 = arith.truncf %6 : vector<8x512xf32> to vector<8x512xbf16>
    %c0_9 = arith.constant 0 : index
    %c0_10 = arith.constant 0 : index
    %15 = vector.load %arg4[%c0_9, %c0_10] : memref<512x128xbf16, #tpu.memory_space<vmem>>, vector<512x128xbf16>
    %cst_11 = arith.constant dense<0.000000e+00> : vector<8x128xf32>
    %16 = tpu.matmul %14, %15, %cst_11 {dimension_numbers = #tpu.dot_dimension_numbers<[1], [0], [0], [1], [0, 0, 1, 1], [], []>} : vector<8x512xbf16>, vector<512x128xbf16>, vector<8x128xf32> -> vector<8x128xf32>
    %17 = vector.broadcast %13 : vector<8x1xf32> to vector<8x128xf32>
    %18 = arith.mulf %16, %17 : vector<8x128xf32>
    %c0_12 = arith.constant 0 : index
    %c0_13 = arith.constant 0 : index
    %19 = vector.load %arg6[%c0_12, %c0_13] : memref<8x128xf32, #tpu.memory_space<vmem>>, vector<8x128xf32>
    tpu.vector_store %arg6[%c0_12, %c0_13], %18 {strides = array<i32>} : memref<8x128xf32, #tpu.memory_space<vmem>>, vector<8x128xf32>,
    %cst_14 = arith.constant dense<0xFF800000> : vector<8xf32>
    %20 = vector.multi_reduction <maximumf>, %18, %cst_14 [1] : vector<8x128xf32> to vector<8xf32>
    %21 = vector.shape_cast %20 : vector<8xf32> to vector<8x1xf32>
    %22 = vector.broadcast %21 : vector<8x1xf32> to vector<8x128xf32>
    %23 = arith.subf %18, %22 : vector<8x128xf32>
    %24 = math.exp %23 : vector<8x128xf32>
    %cst_15 = arith.constant dense<0.000000e+00> : vector<8xf32>
    %25 = vector.multi_reduction <add>, %24, %cst_15 [1] : vector<8x128xf32> to vector<8xf32>
    %26 = vector.shape_cast %25 : vector<8xf32> to vector<8x1xf32>
    %27 = tpu.reciprocal %26 : vector<8x1xf32> -> vector<8x1xf32>
    %28 = vector.broadcast %27 : vector<8x1xf32> to vector<8x128xf32>
    %29 = arith.mulf %24, %28 : vector<8x128xf32>
    %c0_16 = arith.constant 0 : index
    %c0_17 = arith.constant 0 : index
    %30 = vector.load %arg7[%c0_16, %c0_17] : memref<8x128xf32, #tpu.memory_space<vmem>>, vector<8x128xf32>
    tpu.vector_store %arg7[%c0_16, %c0_17], %29 {strides = array<i32>} : memref<8x128xf32, #tpu.memory_space<vmem>>, vector<8x128xf32>,
    %31 = tpu.iota {dimensions = array<i32: 1>} : vector<8x128xi32>
    %32 = vector.broadcast %21 : vector<8x1xf32> to vector<8x128xf32>
    %33 = arith.cmpf oeq, %18, %32 : vector<8x128xf32>
    %c128_i32 = arith.constant 128 : i32
    %34 = vector.broadcast %c128_i32 : i32 to vector<8x128xi32>
    %35 = arith.select %33, %31, %34 : vector<8x128xi1>, vector<8x128xi32>
    %cst_18 = arith.constant dense<2147483647> : vector<8xi32>
    %36 = vector.multi_reduction <minsi>, %35, %cst_18 [1] : vector<8x128xi32> to vector<8xi32>
    %37 = vector.shape_cast %36 : vector<8xi32> to vector<8x1xi32>
    %38 = vector.shape_cast %37 : vector<8x1xi32> to vector<8x1xi32>
    %39 = vector.broadcast %38 : vector<8x1xi32> to vector<8x128xi32>
    %c0_19 = arith.constant 0 : index
    %c0_20 = arith.constant 0 : index
    %40 = vector.load %arg8[%c0_19, %c0_20] : memref<8x128xi32, #tpu.memory_space<vmem>>, vector<8x128xi32>
    tpu.vector_store %arg8[%c0_19, %c0_20], %39 {strides = array<i32>} : memref<8x128xi32, #tpu.memory_space<vmem>>, vector<8x128xi32>,
    return
  }
  func.func @transform_0(%arg0: i32) -> (i32, i32) {
    %c0_i32 = arith.constant 0 : i32
    %c0_i32_0 = arith.constant 0 : i32
    return %arg0, %c0_i32 : i32, i32
  }
  func.func @transform_1(%arg0: i32) -> (i32, i32) {
    %c0_i32 = arith.constant 0 : i32
    %c0_i32_0 = arith.constant 0 : i32
    %c0_i32_1 = arith.constant 0 : i32
    return %c0_i32, %c0_i32_0 : i32, i32
  }
  func.func @transform_2(%arg0: i32) -> (i32, i32) {
    %c0_i32 = arith.constant 0 : i32
    %c0_i32_0 = arith.constant 0 : i32
    %c0_i32_1 = arith.constant 0 : i32
    return %c0_i32, %c0_i32_0 : i32, i32
  }
  func.func @transform_3(%arg0: i32) -> (i32, i32) {
    %c0_i32 = arith.constant 0 : i32
    %c0_i32_0 = arith.constant 0 : i32
    %c0_i32_1 = arith.constant 0 : i32
    return %c0_i32, %c0_i32_0 : i32, i32
  }
  func.func @transform_4(%arg0: i32) -> (i32, i32) {
    %c0_i32 = arith.constant 0 : i32
    %c0_i32_0 = arith.constant 0 : i32
    return %arg0, %c0_i32 : i32, i32
  }
  func.func @transform_5(%arg0: i32) -> (i32, i32) {
    %c0_i32 = arith.constant 0 : i32
    %c0_i32_0 = arith.constant 0 : i32
    return %arg0, %c0_i32 : i32, i32
  }
  func.func @transform_6(%arg0: i32) -> (i32, i32) {
    %c0_i32 = arith.constant 0 : i32
    %c0_i32_0 = arith.constant 0 : i32
    return %arg0, %c0_i32 : i32, i32
  }
  func.func @transform_7(%arg0: i32) -> (i32, i32) {
    %c0_i32 = arith.constant 0 : i32
    %c0_i32_0 = arith.constant 0 : i32
    return %arg0, %c0_i32 : i32, i32
  }
}

</mosaic_0001>

<bundles_post_ra>
// kernel: tpu_custom_call.1
= control target key start
LH: loop header
LB: loop body
LE: loop exit
PB: predicated region body
PF: predicated region fallthrough
CT: control target
= control target key end

     0   :  { %13 = vsyncpa [#allocation3], 0  ;;  %s2228_s0 = inlined_call_operand.hbm [shape: f32[8,512], index: 0, kind: input, shape index: {}]   ;;  %s2229_s1 = inlined_call_operand.hbm [shape: bf16[512,512], index: 1, kind: input, shape index: {}]   ;;  %s2230_s2 = inlined_call_operand.vmem [shape: f32[1,512], index: 2, kind: input, shape index: {}]   ;;  %s2231_s3 = inlined_call_operand.hbm [shape: bf16[512,128], index: 3, kind: input, shape index: {}]   ;;  %s2232_s4 = inlined_call_operand.hbm [shape: f32[8,512], index: 4, kind: output, shape index: {0}]   ;;  %s2233_s5 = inlined_call_operand.hbm [shape: f32[8,128], index: 5, kind: output, shape index: {1}]   ;;  %s2234_s6 = inlined_call_operand.hbm [shape: f32[8,128], index: 6, kind: output, shape index: {2}]   ;;  %s2235_s7 = inlined_call_operand.hbm [shape: s32[8,128], index: 7, kind: output, shape index: {3}]  }
   0x1   :  { %14 = vsyncpa [#allocation6], 0 }
   0x2   :  { %15 = vsyncpa [#allocation4], 0 }
   0x3   :  { %16 = vsyncpa [#allocation10], 0 }
   0x4   :  { %17 = vsyncpa [#allocation13], 0  ;;  %s2090_s24 = smov [#allocation5]   ;;  %s1926_s28 = scalar_lea.hbm %s2229_s1, 16384 }
   0x5   :  { %s33_s25 = sshll.u32 %s2090_s24, 4  ;;  %p1927_p0 = scmp.ne.s32.totalorder %s2229_s1, %s1926_s28  ;;  %s34_s25 = int_to_ptr.vmem [resolvable:$true] %s33_s25 }
   0x6   :  { %p1930_p1 = scmp.lt.u32.totalorder %s1926_s28, %s2229_s1 }
   0x8   :  { %p1932_p2 = pnand %p1930_p1, %p1927_p0 }
   0xa   :  { %1935 = shalt.err (!%p1932_p2)
}
   0xb   :  { %s1936_s10 = scalar_lea.vmem %s34_s25, 16384  ;;  %p1941_p4 = scmp.lt.s32.totalorder %s34_s25, %s34_s25 }
   0xc   :  { %p1937_p3 = scmp.ne.s32.totalorder %s34_s25, %s1936_s10  ;;  %p1942_p5 = scmp.lt.s32.totalorder %s1936_s10, %s1936_s10 }
   0xe   :  { %p1943_p6 = por %p1942_p5, %p1941_p4 }
  0x10   :  { %p1944_p7 = pnand %p1943_p6, %p1937_p3 }
  0x12   :  { %1947 = shalt.err (!%p1944_p7)
}
  0x13   :  { %s2091_s11 = smov 256   ;;  %s2092_s12 = smov 16  }
  0x14   :  { %39 = dma.hbm_to_vmem [thread:$0]  %s2229_s1, 16384, %s34_s25, [#allocation6], %s2091_s11, %s2091_s11, %s2092_s12  }
  0x15   :  { %s2093_s15 = smov [#allocation2]   ;;  %s2094_s17 = smov [#allocation7]  }
  0x16   :  { %s24_s16 = sshll.u32 %s2093_s15, 4  ;;  %s47_s18 = sshll.u32 %s2094_s17, 4  ;;  %s25_s16 = int_to_ptr.vmem [resolvable:$true] %s24_s16  ;;  %s48_s18 = int_to_ptr.vmem [resolvable:$true] %s47_s18 }
  0x17   :  { %s1948_s21 = scalar_lea.hbm %s2228_s0, 512 }
  0x18   :  { %p1949_p8 = scmp.ne.s32.totalorder %s2228_s0, %s1948_s21  ;;  %p1952_p9 = scmp.lt.u32.totalorder %s1948_s21, %s2228_s0 }
  0x1a   :  { %p1954_p10 = pnand %p1952_p9, %p1949_p8 }
  0x1c   :  { %1957 = shalt.err (!%p1954_p10)
}
  0x1d   :  { %s1958_s1 = scalar_lea.vmem %s25_s16, 512  ;;  %p1963_p12 = scmp.lt.s32.totalorder %s25_s16, %s25_s16 }
  0x1e   :  { %p1959_p11 = scmp.ne.s32.totalorder %s25_s16, %s1958_s1  ;;  %p1964_p13 = scmp.lt.s32.totalorder %s1958_s1, %s1958_s1 }
  0x20   :  { %p1965_p0 = por %p1964_p13, %p1963_p12 }
  0x22   :  { %p1966_p1 = pnand %p1965_p0, %p1959_p11 }
  0x24   :  { %1969 = shalt.err (!%p1966_p1)
}
  0x25   :  { %27 = dma.hbm_to_vmem [thread:$0]  %s2228_s0, 512, %s25_s16, [#allocation3]  }
  0x26   :  { %s1970_s30 = scalar_lea.hbm %s2231_s3, 4096 }
  0x27   :  { %p1971_p2 = scmp.ne.s32.totalorder %s2231_s3, %s1970_s30  ;;  %p1974_p3 = scmp.lt.u32.totalorder %s1970_s30, %s2231_s3 }
  0x29   :  { %p1976_p4 = pnand %p1974_p3, %p1971_p2 }
  0x2b   :  { %1979 = shalt.err (!%p1976_p4)
}
  0x2c   :  { %s1980_s12 = scalar_lea.vmem %s48_s18, 4096  ;;  %p1985_p6 = scmp.lt.s32.totalorder %s48_s18, %s48_s18 }
  0x2d   :  { %p1981_p5 = scmp.ne.s32.totalorder %s48_s18, %s1980_s12  ;;  %p1986_p7 = scmp.lt.s32.totalorder %s1980_s12, %s1980_s12 }
  0x2f   :  { %p1987_p8 = por %p1986_p7, %p1985_p6 }
  0x31   :  { %p1988_p9 = pnand %p1987_p8, %p1981_p5 }
  0x33   :  { %1991 = shalt.err (!%p1988_p9)
}
  0x34   :  { %s2095_s0 = smov 64   ;;  %s2096_s13 = smov 4  }
  0x35   :  { %53 = dma.hbm_to_vmem [thread:$0]  %s2231_s3, 4096, %s48_s18, [#allocation6], %s2095_s0, %s2095_s0, %s2096_s13  }
  0x36   :  { %2080 = dma.done.wait [#allocation3], 512  }
  0x37   :  { %2081 = vsyncadd [#allocation3], 4294966784 }
  0x38   :  { %2082 = dma.done.wait [#allocation6], 20480  }
  0x39   :  { %2083 = vsyncadd [#allocation6], 4294946816  ;;  %v1696_v0 = vld [vmem:[#allocation5 + $0x4] ss:$16 sps:$4 sm:$0xff]   ;;  %v1698_v1 = vld [vmem:[#allocation5 + $0xc] ss:$16 sps:$4 sm:$0xff]  }
  0x3a   :  { %862 = vmatprep.subr.bf16.mxu0 %v1696_v0  ;;  %v1700_v2 = vld [vmem:[#allocation5] ss:$16 sps:$4 sm:$0xff]   ;;  %v1701_v3 = vld [vmem:[#allocation5 + $0x8] ss:$16 sps:$4 sm:$0xff]   ;;  %944 = vmatprep.subr.bf16.mxu1 %v1698_v1  ;;  %v1702_v4 = vld [vmem:[#allocation5 + $0x24] ss:$16 sps:$4 sm:$0xff]  }
  0x3b   :  { %863 = vmatpush1.bf16.msra.mxu0 %v1700_v2  ;;  %945 = vmatpush1.bf16.msra.mxu1 %v1701_v3  ;;  %v1704_v5 = vld [vmem:[#allocation5 + $0x2c] ss:$16 sps:$4 sm:$0xff]   ;;  %v1706_v6 = vld [vmem:[#allocation5 + $0x20] ss:$16 sps:$4 sm:$0xff]   ;;  %v1707_v7 = vld [vmem:[#allocation5 + $0x28] ss:$16 sps:$4 sm:$0xff]  }
  0x3c   :  { %864 = vmatprep.subr.bf16.mxu0 %v1702_v4  ;;  %946 = vmatprep.subr.bf16.mxu1 %v1704_v5  ;;  %v1708_v8 = vld [vmem:[#allocation5 + $0x44] ss:$16 sps:$4 sm:$0xff]   ;;  %v1710_v9 = vld [vmem:[#allocation5 + $0x4c] ss:$16 sps:$4 sm:$0xff]   ;;  %v1712_v10 = vld [vmem:[#allocation5 + $0x40] ss:$16 sps:$4 sm:$0xff]  }
  0x3d   :  { %v1713_v11 = vld [vmem:[#allocation5 + $0x48] ss:$16 sps:$4 sm:$0xff]   ;;  %v1714_v12 = vld [vmem:[#allocation5 + $0x64] ss:$16 sps:$4 sm:$0xff]   ;;  %v1716_v13 = vld [vmem:[#allocation5 + $0x6c] ss:$16 sps:$4 sm:$0xff]  }
  0x3e   :  { %v1718_v14 = vld [vmem:[#allocation5 + $0x60] ss:$16 sps:$4 sm:$0xff]   ;;  %v1719_v15 = vld [vmem:[#allocation5 + $0x68] ss:$16 sps:$4 sm:$0xff]   ;;  %v1720_v16 = vld [vmem:[#allocation5 + $0x84] ss:$16 sps:$4 sm:$0xff]  }
  0x3f   :  { %865 = vmatpush1.bf16.msra.mxu0 %v1706_v6  ;;  %947 = vmatpush1.bf16.msra.mxu1 %v1707_v7  ;;  %v1722_v17 = vld [vmem:[#allocation5 + $0x8c] ss:$16 sps:$4 sm:$0xff]   ;;  %v1724_v18 = vld [vmem:[#allocation5 + $0x80] ss:$16 sps:$4 sm:$0xff]   ;;  %v1725_v19 = vld [vmem:[#allocation5 + $0x88] ss:$16 sps:$4 sm:$0xff]  }
  0x40   :  { %866 = vmatprep.subr.bf16.mxu0 %v1708_v8  ;;  %948 = vmatprep.subr.bf16.mxu1 %v1710_v9  ;;  %v1726_v20 = vld [vmem:[#allocation5 + $0xa4] ss:$16 sps:$4 sm:$0xff]   ;;  %v1728_v21 = vld [vmem:[#allocation5 + $0xac] ss:$16 sps:$4 sm:$0xff]   ;;  %v1730_v22 = vld [vmem:[#allocation5 + $0xa0] ss:$16 sps:$4 sm:$0xff]  }
  0x41   :  { %v1731_v23 = vld [vmem:[#allocation5 + $0xa8] ss:$16 sps:$4 sm:$0xff]   ;;  %v1732_v24 = vld [vmem:[#allocation5 + $0xc4] ss:$16 sps:$4 sm:$0xff]   ;;  %v1734_v25 = vld [vmem:[#allocation5 + $0xcc] ss:$16 sps:$4 sm:$0xff]  }
  0x42   :  { %v1736_v26 = vld [vmem:[#allocation5 + $0xc0] ss:$16 sps:$4 sm:$0xff]   ;;  %v1737_v27 = vld [vmem:[#allocation5 + $0xc8] ss:$16 sps:$4 sm:$0xff]   ;;  %v1738_v28 = vld [vmem:[#allocation5 + $0xe4] ss:$16 sps:$4 sm:$0xff]  }
  0x43   :  { %867 = vmatpush1.bf16.msra.mxu0 %v1712_v10  ;;  %949 = vmatpush1.bf16.msra.mxu1 %v1713_v11  ;;  %v1740_v29 = vld [vmem:[#allocation5 + $0xec] ss:$16 sps:$4 sm:$0xff]   ;;  %v1742_v30 = vld [vmem:[#allocation5 + $0xe0] ss:$16 sps:$4 sm:$0xff]   ;;  %v1743_v31 = vld [vmem:[#allocation5 + $0xe8] ss:$16 sps:$4 sm:$0xff]  }
  0x44   :  { %868 = vmatprep.subr.bf16.mxu0 %v1714_v12  ;;  %950 = vmatprep.subr.bf16.mxu1 %v1716_v13  ;;  %v1744_v32 = vld [vmem:[#allocation5 + $0x104] ss:$16 sps:$4 sm:$0xff]   ;;  %v1746_v33 = vld [vmem:[#allocation5 + $0x10c] ss:$16 sps:$4 sm:$0xff]   ;;  %v1748_v34 = vld [vmem:[#allocation5 + $0x100] ss:$16 sps:$4 sm:$0xff]  }
  0x45   :  { %v1749_v35 = vld [vmem:[#allocation5 + $0x108] ss:$16 sps:$4 sm:$0xff]   ;;  %v1750_v36 = vld [vmem:[#allocation5 + $0x124] ss:$16 sps:$4 sm:$0xff]   ;;  %v1752_v37 = vld [vmem:[#allocation5 + $0x12c] ss:$16 sps:$4 sm:$0xff]  }
  0x46   :  { %v1754_v38 = vld [vmem:[#allocation5 + $0x120] ss:$16 sps:$4 sm:$0xff]   ;;  %v1755_v39 = vld [vmem:[#allocation5 + $0x128] ss:$16 sps:$4 sm:$0xff]   ;;  %v1756_v40 = vld [vmem:[#allocation5 + $0x144] ss:$16 sps:$4 sm:$0xff]  }
  0x47   :  { %869 = vmatpush1.bf16.msra.mxu0 %v1718_v14  ;;  %951 = vmatpush1.bf16.msra.mxu1 %v1719_v15  ;;  %v1758_v41 = vld [vmem:[#allocation5 + $0x14c] ss:$16 sps:$4 sm:$0xff]   ;;  %v1760_v42 = vld [vmem:[#allocation5 + $0x140] ss:$16 sps:$4 sm:$0xff]   ;;  %v1761_v43 = vld [vmem:[#allocation5 + $0x148] ss:$16 sps:$4 sm:$0xff]  }
  0x48   :  { %870 = vmatprep.subr.bf16.mxu0 %v1720_v16  ;;  %952 = vmatprep.subr.bf16.mxu1 %v1722_v17  ;;  %v1762_v44 = vld [vmem:[#allocation5 + $0x164] ss:$16 sps:$4 sm:$0xff]   ;;  %v1764_v45 = vld [vmem:[#allocation5 + $0x16c] ss:$16 sps:$4 sm:$0xff]   ;;  %v1766_v47 = vld [vmem:[#allocation5 + $0x160] ss:$16 sps:$4 sm:$0xff]  }
  0x49   :  { %v65_v46 = vld [vmem:[#allocation2 + $0x8] sm:$0xff]  ;;  %v1768_v50 = vld [vmem:[#allocation5 + $0x184] ss:$16 sps:$4 sm:$0xff]   ;;  %v1772_v52 = vld [vmem:[#allocation5 + $0x180] ss:$16 sps:$4 sm:$0xff]   ;;  %s2098_s18 = smov [#allocation8]  }
  0x4a   :  { %v69_v48 = vpack.c.bf16 %v65_v46, %v65_v46  ;;  %v1767_v49 = vld [vmem:[#allocation5 + $0x168] ss:$16 sps:$4 sm:$0xff]   ;;  %v1770_v51 = vld [vmem:[#allocation5 + $0x18c] ss:$16 sps:$4 sm:$0xff]   ;;  %v1774_v54 = vld [vmem:[#allocation5 + $0x1a4] ss:$16 sps:$4 sm:$0xff]  }
  0x4b   :  { %871 = vmatpush1.bf16.msra.mxu0 %v1724_v18  ;;  %953 = vmatpush1.bf16.msra.mxu1 %v1725_v19  ;;  %v1773_v53 = vld [vmem:[#allocation5 + $0x188] ss:$16 sps:$4 sm:$0xff]   ;;  %v1776_v55 = vld [vmem:[#allocation5 + $0x1ac] ss:$16 sps:$4 sm:$0xff]   ;;  %v1778_v56 = vld [vmem:[#allocation5 + $0x1a0] ss:$16 sps:$4 sm:$0xff]  }
  0x4c   :  { %872 = vmatprep.subr.bf16.mxu0 %v1726_v20  ;;  %954 = vmatprep.subr.bf16.mxu1 %v1728_v21  ;;  %v1779_v57 = vld [vmem:[#allocation5 + $0x1a8] ss:$16 sps:$4 sm:$0xff]   ;;  %v1780_v58 = vld [vmem:[#allocation5 + $0x1c4] ss:$16 sps:$4 sm:$0xff]   ;;  %v1782_v59 = vld [vmem:[#allocation5 + $0x1cc] ss:$16 sps:$4 sm:$0xff]  }
  0x4d   :  { %894 = vmatprep.mubr.bf16.mxu0 %v69_v48  ;;  %976 = vmatprep.mubr.bf16.mxu1 %v69_v48  ;;  %v1784_v60 = vld [vmem:[#allocation5 + $0x1c0] ss:$16 sps:$4 sm:$0xff]   ;;  %v1785_v61 = vld [vmem:[#allocation5 + $0x1c8] ss:$16 sps:$4 sm:$0xff]   ;;  %v1786_v62 = vld [vmem:[#allocation5 + $0x1e4] ss:$16 sps:$4 sm:$0xff]  }
  0x4e   :  { %v1788_v63 = vld [vmem:[#allocation5 + $0x1ec] ss:$16 sps:$4 sm:$0xff]   ;;  %v1790_v0 = vld [vmem:[#allocation5 + $0x1e0] ss:$16 sps:$4 sm:$0xff]   ;;  %v1791_v1 = vld [vmem:[#allocation5 + $0x1e8] ss:$16 sps:$4 sm:$0xff]  }
  0x4f   :  { %873 = vmatpush1.bf16.msra.mxu0 %v1730_v22  ;;  %955 = vmatpush1.bf16.msra.mxu1 %v1731_v23  ;;  %v64_v2 = vld [vmem:[#allocation2] sm:$0xff]  ;;  %v1797_v4 = vld [vmem:[#allocation5 + $0x20c] ss:$16 sps:$4 sm:$0xff]   ;;  %v1795_v7 = vld [vmem:[#allocation5 + $0x208] ss:$16 sps:$4 sm:$0xff]   ;;  %s1418_s19 = sshll.u32 %s2098_s18, 4  ;;  %s1419_s19 = int_to_ptr.vmem [resolvable:$true] %s1418_s19 }
  0x50   :  { %874 = vmatprep.subr.bf16.mxu0 %v1732_v24  ;;  %956 = vmatprep.subr.bf16.mxu1 %v1734_v25  ;;  %v1794_v3 = vld [vmem:[#allocation5 + $0x204] ss:$16 sps:$4 sm:$0xff]   ;;  %v68_v5 = vpack.c.bf16 %v64_v2, %v64_v2  ;;  %v1792_v6 = vld [vmem:[#allocation5 + $0x200] ss:$16 sps:$4 sm:$0xff]   ;;  %v1803_v9 = vld [vmem:[#allocation5 + $0x22c] ss:$16 sps:$4 sm:$0xff]  }
  0x51   :  { %v1800_v8 = vld [vmem:[#allocation5 + $0x224] ss:$16 sps:$4 sm:$0xff]   ;;  %v1798_v10 = vld [vmem:[#allocation5 + $0x220] ss:$16 sps:$4 sm:$0xff]   ;;  %v1801_v11 = vld [vmem:[#allocation5 + $0x228] ss:$16 sps:$4 sm:$0xff]  }
  0x52   :  { %v1806_v12 = vld [vmem:[#allocation5 + $0x244] ss:$16 sps:$4 sm:$0xff]   ;;  %v1809_v13 = vld [vmem:[#allocation5 + $0x24c] ss:$16 sps:$4 sm:$0xff]   ;;  %v1804_v14 = vld [vmem:[#allocation5 + $0x240] ss:$16 sps:$4 sm:$0xff]  }
  0x53   :  { %875 = vmatpush1.bf16.msra.mxu0 %v1736_v26  ;;  %957 = vmatpush1.bf16.msra.mxu1 %v1737_v27  ;;  %v1807_v15 = vld [vmem:[#allocation5 + $0x248] ss:$16 sps:$4 sm:$0xff]   ;;  %v1812_v16 = vld [vmem:[#allocation5 + $0x264] ss:$16 sps:$4 sm:$0xff]   ;;  %v1815_v17 = vld [vmem:[#allocation5 + $0x26c] ss:$16 sps:$4 sm:$0xff]  }
  0x54   :  { %876 = vmatprep.subr.bf16.mxu0 %v1738_v28  ;;  %958 = vmatprep.subr.bf16.mxu1 %v1740_v29  ;;  %v1810_v18 = vld [vmem:[#allocation5 + $0x260] ss:$16 sps:$4 sm:$0xff]   ;;  %v1813_v19 = vld [vmem:[#allocation5 + $0x268] ss:$16 sps:$4 sm:$0xff]   ;;  %v1818_v20 = vld [vmem:[#allocation5 + $0x284] ss:$16 sps:$4 sm:$0xff]  }
  0x55   :  { %v1821_v21 = vld [vmem:[#allocation5 + $0x28c] ss:$16 sps:$4 sm:$0xff]   ;;  %v1816_v22 = vld [vmem:[#allocation5 + $0x280] ss:$16 sps:$4 sm:$0xff]   ;;  %v1819_v23 = vld [vmem:[#allocation5 + $0x288] ss:$16 sps:$4 sm:$0xff]  }
  0x56   :  { %v1824_v24 = vld [vmem:[#allocation5 + $0x2a4] ss:$16 sps:$4 sm:$0xff]   ;;  %v1827_v25 = vld [vmem:[#allocation5 + $0x2ac] ss:$16 sps:$4 sm:$0xff]   ;;  %v1822_v26 = vld [vmem:[#allocation5 + $0x2a0] ss:$16 sps:$4 sm:$0xff]  }
  0x57   :  { %877 = vmatpush1.bf16.msra.mxu0 %v1742_v30  ;;  %959 = vmatpush1.bf16.msra.mxu1 %v1743_v31  ;;  %v1825_v27 = vld [vmem:[#allocation5 + $0x2a8] ss:$16 sps:$4 sm:$0xff]   ;;  %v1830_v28 = vld [vmem:[#allocation5 + $0x2c4] ss:$16 sps:$4 sm:$0xff]   ;;  %v1833_v29 = vld [vmem:[#allocation5 + $0x2cc] ss:$16 sps:$4 sm:$0xff]  }
  0x58   :  { %878 = vmatprep.subr.bf16.mxu0 %v1744_v32  ;;  %960 = vmatprep.subr.bf16.mxu1 %v1746_v33  ;;  %v1828_v30 = vld [vmem:[#allocation5 + $0x2c0] ss:$16 sps:$4 sm:$0xff]   ;;  %v67_v31 = vld [vmem:[#allocation2 + $0x18] sm:$0xff]  ;;  %v1854_v46 = vld [vmem:[#allocation5 + $0x344] ss:$16 sps:$4 sm:$0xff]  }
  0x59   :  { %v1831_v32 = vld [vmem:[#allocation5 + $0x2c8] ss:$16 sps:$4 sm:$0xff]   ;;  %v71_v33 = vpack.c.bf16 %v67_v31, %v67_v31  ;;  %v1852_v48 = vld [vmem:[#allocation5 + $0x340] ss:$16 sps:$4 sm:$0xff]   ;;  %v1884_v2 = vld [vmem:[#allocation5 + $0x3e4] ss:$16 sps:$4 sm:$0xff]  }
  0x5a   :  { %v1911_v31 = vld [vmem:[#allocation7 + $0xa8] sm:$0xff]  }
  0x5b   :  { %879 = vmatpush1.bf16.msra.mxu0 %v1748_v34  ;;  %961 = vmatpush1.bf16.msra.mxu1 %v1749_v35  ;;  %v1836_v34 = vld [vmem:[#allocation5 + $0x2e4] ss:$16 sps:$4 sm:$0xff]   ;;  %v1839_v35 = vld [vmem:[#allocation5 + $0x2ec] ss:$16 sps:$4 sm:$0xff]  }
  0x5c   :  { %880 = vmatprep.subr.bf16.mxu0 %v1750_v36  ;;  %962 = vmatprep.subr.bf16.mxu1 %v1752_v37  ;;  %v1834_v36 = vld [vmem:[#allocation5 + $0x2e0] ss:$16 sps:$4 sm:$0xff]   ;;  %v1837_v37 = vld [vmem:[#allocation5 + $0x2e8] ss:$16 sps:$4 sm:$0xff]  }
  0x5f   :  { %881 = vmatpush1.bf16.msra.mxu0 %v1754_v38  ;;  %963 = vmatpush1.bf16.msra.mxu1 %v1755_v39  ;;  %v1842_v38 = vld [vmem:[#allocation5 + $0x304] ss:$16 sps:$4 sm:$0xff]   ;;  %v1845_v39 = vld [vmem:[#allocation5 + $0x30c] ss:$16 sps:$4 sm:$0xff]  }
  0x60   :  { %882 = vmatprep.subr.bf16.mxu0 %v1756_v40  ;;  %964 = vmatprep.subr.bf16.mxu1 %v1758_v41  ;;  %v1840_v40 = vld [vmem:[#allocation5 + $0x300] ss:$16 sps:$4 sm:$0xff]   ;;  %v1843_v41 = vld [vmem:[#allocation5 + $0x308] ss:$16 sps:$4 sm:$0xff]  }
  0x63   :  { %883 = vmatpush1.bf16.msra.mxu0 %v1760_v42  ;;  %965 = vmatpush1.bf16.msra.mxu1 %v1761_v43  ;;  %v1848_v42 = vld [vmem:[#allocation5 + $0x324] ss:$16 sps:$4 sm:$0xff]   ;;  %v1851_v43 = vld [vmem:[#allocation5 + $0x32c] ss:$16 sps:$4 sm:$0xff]  }
  0x64   :  { %884 = vmatprep.subr.bf16.mxu0 %v1762_v44  ;;  %966 = vmatprep.subr.bf16.mxu1 %v1764_v45  ;;  %v1846_v44 = vld [vmem:[#allocation5 + $0x320] ss:$16 sps:$4 sm:$0xff]   ;;  %v1849_v45 = vld [vmem:[#allocation5 + $0x328] ss:$16 sps:$4 sm:$0xff]  }
  0x67   :  { %885 = vmatpush1.bf16.msra.mxu0 %v1766_v47  ;;  %967 = vmatpush1.bf16.msra.mxu1 %v1767_v49  ;;  %v1857_v47 = vld [vmem:[#allocation5 + $0x34c] ss:$16 sps:$4 sm:$0xff]   ;;  %v1855_v49 = vld [vmem:[#allocation5 + $0x348] ss:$16 sps:$4 sm:$0xff]  }
  0x68   :  { %886 = vmatprep.subr.bf16.mxu0 %v1768_v50  ;;  %968 = vmatprep.subr.bf16.mxu1 %v1770_v51  ;;  %v1860_v50 = vld [vmem:[#allocation5 + $0x364] ss:$16 sps:$4 sm:$0xff]   ;;  %v1863_v51 = vld [vmem:[#allocation5 + $0x36c] ss:$16 sps:$4 sm:$0xff]  }
  0x6b   :  { %887 = vmatpush1.bf16.msra.mxu0 %v1772_v52  ;;  %969 = vmatpush1.bf16.msra.mxu1 %v1773_v53  ;;  %v1858_v52 = vld [vmem:[#allocation5 + $0x360] ss:$16 sps:$4 sm:$0xff]   ;;  %v1861_v53 = vld [vmem:[#allocation5 + $0x368] ss:$16 sps:$4 sm:$0xff]  }
  0x6c   :  { %888 = vmatprep.subr.bf16.mxu0 %v1774_v54  ;;  %970 = vmatprep.subr.bf16.mxu1 %v1776_v55  ;;  %v1866_v54 = vld [vmem:[#allocation5 + $0x384] ss:$16 sps:$4 sm:$0xff]   ;;  %v1869_v55 = vld [vmem:[#allocation5 + $0x38c] ss:$16 sps:$4 sm:$0xff]  }
  0x6f   :  { %889 = vmatpush1.bf16.msra.mxu0 %v1778_v56  ;;  %971 = vmatpush1.bf16.msra.mxu1 %v1779_v57  ;;  %v1864_v56 = vld [vmem:[#allocation5 + $0x380] ss:$16 sps:$4 sm:$0xff]   ;;  %v1867_v57 = vld [vmem:[#allocation5 + $0x388] ss:$16 sps:$4 sm:$0xff]  }
  0x70   :  { %890 = vmatprep.subr.bf16.mxu0 %v1780_v58  ;;  %972 = vmatprep.subr.bf16.mxu1 %v1782_v59  ;;  %v1872_v58 = vld [vmem:[#allocation5 + $0x3a4] ss:$16 sps:$4 sm:$0xff]   ;;  %v1875_v59 = vld [vmem:[#allocation5 + $0x3ac] ss:$16 sps:$4 sm:$0xff]  }
  0x73   :  { %891 = vmatpush1.bf16.msra.mxu0 %v1784_v60  ;;  %973 = vmatpush1.bf16.msra.mxu1 %v1785_v61  ;;  %v1870_v60 = vld [vmem:[#allocation5 + $0x3a0] ss:$16 sps:$4 sm:$0xff]   ;;  %v1873_v61 = vld [vmem:[#allocation5 + $0x3a8] ss:$16 sps:$4 sm:$0xff]  }
  0x74   :  { %892 = vmatprep.subr.bf16.mxu0 %v1786_v62  ;;  %974 = vmatprep.subr.bf16.mxu1 %v1788_v63  ;;  %v1878_v62 = vld [vmem:[#allocation5 + $0x3c4] ss:$16 sps:$4 sm:$0xff]   ;;  %v1881_v63 = vld [vmem:[#allocation5 + $0x3cc] ss:$16 sps:$4 sm:$0xff]  }
  0x77   :  { %893 = vmatpush1.bf16.msra.mxu0 %v1790_v0  ;;  %975 = vmatpush1.bf16.msra.mxu1 %v1791_v1  ;;  %v1876_v0 = vld [vmem:[#allocation5 + $0x3c0] ss:$16 sps:$4 sm:$0xff]   ;;  %v1879_v1 = vld [vmem:[#allocation5 + $0x3c8] ss:$16 sps:$4 sm:$0xff]  }
  0x78   :  { %903 = vmatprep.subr.bf16.mxu0 %v1794_v3  ;;  %985 = vmatprep.subr.bf16.mxu1 %v1797_v4  ;;  %v1887_v3 = vld [vmem:[#allocation5 + $0x3ec] ss:$16 sps:$4 sm:$0xff]   ;;  %v1882_v4 = vld [vmem:[#allocation5 + $0x3e0] ss:$16 sps:$4 sm:$0xff]  }
  0x7a   :  { %895 = vmatmul.mubr.bf16.vlgmr.msra.gmra.mrb[0].mxu0 %v68_v5  ;;  %977 = vmatmul.mubr.bf16.vlgmr.msra.gmra.mrb[0].mxu1 %v68_v5  ;;  %v1885_v5 = vld [vmem:[#allocation5 + $0x3e8] ss:$16 sps:$4 sm:$0xff]  }
  0x7b   :  { %904 = vmatpush1.bf16.msra.mxu0 %v1792_v6  ;;  %986 = vmatpush1.bf16.msra.mxu1 %v1795_v7  ;;  %v66_v6 = vld [vmem:[#allocation2 + $0x10] sm:$0xff]  ;;  %v1888_v7 = vld [vmem:[#allocation7 + $0x40] sm:$0xff]  }
  0x7c   :  { %905 = vmatprep.subr.bf16.mxu0 %v1800_v8  ;;  %987 = vmatprep.subr.bf16.mxu1 %v1803_v9  ;;  %v1889_v8 = vld [vmem:[#allocation7 + $0xc0] sm:$0xff]   ;;  %v70_v9 = vpack.c.bf16 %v66_v6, %v66_v6 }
  0x7d   :  { %935 = vmatprep.mubr.bf16.mxu0 %v71_v33  ;;  %1017 = vmatprep.mubr.bf16.mxu1 %v71_v33  ;;  %v1913_v33 = vld [vmem:[#allocation7 + $0xf0] sm:$0xff]  }
  0x7f   :  { %906 = vmatpush1.bf16.msra.mxu0 %v1798_v10  ;;  %988 = vmatpush1.bf16.msra.mxu1 %v1801_v11  ;;  %v1890_v10 = vld [vmem:[#allocation7] sm:$0xff]  }
  0x80   :  { %907 = vmatprep.subr.bf16.mxu0 %v1806_v12  ;;  %989 = vmatprep.subr.bf16.mxu1 %v1809_v13  ;;  %v1891_v11 = vld [vmem:[#allocation7 + $0x80] sm:$0xff]   ;;  %v1892_v12 = vld [vmem:[#allocation7 + $0x48] sm:$0xff]  }
  0x81   :  { %v1893_v13 = vld [vmem:[#allocation7 + $0xc8] sm:$0xff]  }
  0x83   :  { %908 = vmatpush1.bf16.msra.mxu0 %v1804_v14  ;;  %990 = vmatpush1.bf16.msra.mxu1 %v1807_v15  ;;  %v1894_v14 = vld [vmem:[#allocation7 + $0x8] sm:$0xff]  }
  0x84   :  { %909 = vmatprep.subr.bf16.mxu0 %v1812_v16  ;;  %991 = vmatprep.subr.bf16.mxu1 %v1815_v17  ;;  %v1895_v15 = vld [vmem:[#allocation7 + $0x88] sm:$0xff]   ;;  %v1896_v16 = vld [vmem:[#allocation7 + $0x50] sm:$0xff]  }
  0x85   :  { %v1897_v17 = vld [vmem:[#allocation7 + $0xd0] sm:$0xff]  }
  0x87   :  { %910 = vmatpush1.bf16.msra.mxu0 %v1810_v18  ;;  %992 = vmatpush1.bf16.msra.mxu1 %v1813_v19  ;;  %v1898_v18 = vld [vmem:[#allocation7 + $0x10] sm:$0xff]  }
  0x88   :  { %911 = vmatprep.subr.bf16.mxu0 %v1818_v20  ;;  %993 = vmatprep.subr.bf16.mxu1 %v1821_v21  ;;  %v1899_v19 = vld [vmem:[#allocation7 + $0x90] sm:$0xff]   ;;  %v1900_v20 = vld [vmem:[#allocation7 + $0x58] sm:$0xff]  }
  0x89   :  { %v1901_v21 = vld [vmem:[#allocation7 + $0xd8] sm:$0xff]  }
  0x8b   :  { %912 = vmatpush1.bf16.msra.mxu0 %v1816_v22  ;;  %994 = vmatpush1.bf16.msra.mxu1 %v1819_v23  ;;  %v1902_v22 = vld [vmem:[#allocation7 + $0x18] sm:$0xff]  }
  0x8c   :  { %913 = vmatprep.subr.bf16.mxu0 %v1824_v24  ;;  %995 = vmatprep.subr.bf16.mxu1 %v1827_v25  ;;  %v1903_v23 = vld [vmem:[#allocation7 + $0x98] sm:$0xff]   ;;  %v1904_v24 = vld [vmem:[#allocation7 + $0x60] sm:$0xff]  }
  0x8d   :  { %v1905_v25 = vld [vmem:[#allocation7 + $0xe0] sm:$0xff]  }
  0x8f   :  { %914 = vmatpush1.bf16.msra.mxu0 %v1822_v26  ;;  %996 = vmatpush1.bf16.msra.mxu1 %v1825_v27  ;;  %v1906_v26 = vld [vmem:[#allocation7 + $0x20] sm:$0xff]  }
  0x90   :  { %915 = vmatprep.subr.bf16.mxu0 %v1830_v28  ;;  %997 = vmatprep.subr.bf16.mxu1 %v1833_v29  ;;  %v1907_v27 = vld [vmem:[#allocation7 + $0xa0] sm:$0xff]   ;;  %v1908_v28 = vld [vmem:[#allocation7 + $0x68] sm:$0xff]  }
  0x91   :  { %v1909_v29 = vld [vmem:[#allocation7 + $0xe8] sm:$0xff]  }
  0x93   :  { %916 = vmatpush1.bf16.msra.mxu0 %v1828_v30  ;;  %998 = vmatpush1.bf16.msra.mxu1 %v1831_v32  ;;  %v1910_v30 = vld [vmem:[#allocation7 + $0x28] sm:$0xff]   ;;  %v1912_v32 = vld [vmem:[#allocation7 + $0x70] sm:$0xff]  }
  0x94   :  { %917 = vmatprep.subr.bf16.mxu0 %v1836_v34  ;;  %999 = vmatprep.subr.bf16.mxu1 %v1839_v35  ;;  %v1914_v34 = vld [vmem:[#allocation7 + $0x30] sm:$0xff]  }
  0x95   :  { %v1915_v35 = vld [vmem:[#allocation7 + $0xb0] sm:$0xff]  }
  0x97   :  { %918 = vmatpush1.bf16.msra.mxu0 %v1834_v36  ;;  %1000 = vmatpush1.bf16.msra.mxu1 %v1837_v37  ;;  %v1916_v36 = vld [vmem:[#allocation7 + $0x78] sm:$0xff]  }
  0x98   :  { %919 = vmatprep.subr.bf16.mxu0 %v1842_v38  ;;  %1001 = vmatprep.subr.bf16.mxu1 %v1845_v39  ;;  %v1917_v37 = vld [vmem:[#allocation7 + $0xf8] sm:$0xff]  }
  0x99   :  { %v1918_v38 = vld [vmem:[#allocation7 + $0x38] sm:$0xff]  }
  0x9a   :  { %v1919_v39 = vld [vmem:[#allocation7 + $0xb8] sm:$0xff]  }
  0x9b   :  { %920 = vmatpush1.bf16.msra.mxu0 %v1840_v40  ;;  %1002 = vmatpush1.bf16.msra.mxu1 %v1843_v41  ;;  %v202_v40 = vlaneseq }
  0x9c   :  { %921 = vmatprep.subr.bf16.mxu0 %v1848_v42  ;;  %1003 = vmatprep.subr.bf16.mxu1 %v1851_v43 }
  0x9d   :  { %v203_v41 = vshrl.u32 %v202_v40, 7 }
  0x9f   :  { %922 = vmatpush1.bf16.msra.mxu0 %v1846_v44  ;;  %1004 = vmatpush1.bf16.msra.mxu1 %v1849_v45  ;;  %v204_v42 = vsub.s32 0, %v203_v41  ;;  %v212_v43 = vsub.s32 2, %v203_v41  ;;  %v200_v44 = vld [vmem:[%s2230_s2] sm:$0xf]  ;;  %v208_v45 = vsub.s32 1, %v203_v41  ;;  %s2097_s2 = smov [#allocation9]  }
  0xa0   :  { %923 = vmatprep.subr.bf16.mxu0 %v1854_v46  ;;  %1005 = vmatprep.subr.bf16.mxu1 %v1857_v47  ;;  %v216_v46 = vsub.s32 3, %v203_v41  ;;  %s1428_s17 = sshll.u32 %s2097_s2, 4  ;;  %s1429_s17 = int_to_ptr.vmem [resolvable:$true] %s1428_s17 }
  0xa1   :  { %v205_v47 = vrot.slane %v200_v44, %v204_v42  ;;  %s1992_s20 = scalar_lea.vmem %s1429_s17, 128  ;;  %p1997_p11 = scmp.lt.s32.totalorder %s1429_s17, %s1429_s17 }
  0xa2   :  { %p1993_p10 = scmp.ne.s32.totalorder %s1429_s17, %s1992_s20  ;;  %p1998_p12 = scmp.lt.s32.totalorder %s1992_s20, %s1992_s20 }
  0xa3   :  { %924 = vmatpush1.bf16.msra.mxu0 %v1852_v48  ;;  %1006 = vmatpush1.bf16.msra.mxu1 %v1855_v49  ;;  %v213_v48 = vrot.slane %v200_v44, %v212_v43  ;;  %v209_v49 = vrot.slane %v200_v44, %v208_v45 }
  0xa4   :  { %925 = vmatprep.subr.bf16.mxu0 %v1860_v50  ;;  %1007 = vmatprep.subr.bf16.mxu1 %v1863_v51  ;;  %v217_v50 = vrot.slane %v200_v44, %v216_v46  ;;  %p1999_p13 = por %p1998_p12, %p1997_p11 }
  0xa6   :  { %p2000_p0 = pnand %p1999_p13, %p1993_p10 }
  0xa7   :  { %926 = vmatpush1.bf16.msra.mxu0 %v1858_v52  ;;  %1008 = vmatpush1.bf16.msra.mxu1 %v1861_v53 }
  0xa8   :  { %927 = vmatprep.subr.bf16.mxu0 %v1866_v54  ;;  %1009 = vmatprep.subr.bf16.mxu1 %v1869_v55 }
  0xab   :  { %928 = vmatpush1.bf16.msra.mxu0 %v1864_v56  ;;  %1010 = vmatpush1.bf16.msra.mxu1 %v1867_v57 }
  0xac   :  { %929 = vmatprep.subr.bf16.mxu0 %v1872_v58  ;;  %1011 = vmatprep.subr.bf16.mxu1 %v1875_v59 }
  0xaf   :  { %930 = vmatpush1.bf16.msra.mxu0 %v1870_v60  ;;  %1012 = vmatpush1.bf16.msra.mxu1 %v1873_v61 }
  0xb0   :  { %931 = vmatprep.subr.bf16.mxu0 %v1878_v62  ;;  %1013 = vmatprep.subr.bf16.mxu1 %v1881_v63 }
  0xb3   :  { %932 = vmatpush1.bf16.msra.mxu0 %v1876_v0  ;;  %1014 = vmatpush1.bf16.msra.mxu1 %v1879_v1 }
  0xb4   :  { %933 = vmatprep.subr.bf16.mxu0 %v1884_v2  ;;  %1015 = vmatprep.subr.bf16.mxu1 %v1887_v3 }
  0xb7   :  { %934 = vmatpush1.bf16.msra.mxu0 %v1882_v4  ;;  %1016 = vmatpush1.bf16.msra.mxu1 %v1885_v5 }
  0xb8   :  { %1629 = vmatprep.subr.bf16.mxu0 %v1888_v7  ;;  %1651 = vmatprep.subr.bf16.mxu1 %v1889_v8 }
  0xba   :  { %936 = vmatmul.mubr.bf16.vlgmr.msra.gmra.mrb[0].mxu0 %v70_v9  ;;  %1018 = vmatmul.mubr.bf16.vlgmr.msra.gmra.mrb[0].mxu1 %v70_v9 }
  0xbb   :  { %1630 = vmatpush3.bf16.msra.mxu0 %v1890_v10  ;;  %1652 = vmatpush3.bf16.msra.mxu1 %v1891_v11 }
  0xbc   :  { %1631 = vmatprep.subr.bf16.mxu0 %v1892_v12  ;;  %1653 = vmatprep.subr.bf16.mxu1 %v1893_v13 }
  0xbf   :  { %1632 = vmatpush3.bf16.msra.mxu0 %v1894_v14  ;;  %1654 = vmatpush3.bf16.msra.mxu1 %v1895_v15 }
  0xc0   :  { %1633 = vmatprep.subr.bf16.mxu0 %v1896_v16  ;;  %1655 = vmatprep.subr.bf16.mxu1 %v1897_v17 }
  0xc3   :  { %1634 = vmatpush3.bf16.msra.mxu0 %v1898_v18  ;;  %1656 = vmatpush3.bf16.msra.mxu1 %v1899_v19 }
  0xc4   :  { %1635 = vmatprep.subr.bf16.mxu0 %v1900_v20  ;;  %1657 = vmatprep.subr.bf16.mxu1 %v1901_v21 }
  0xc7   :  { %1636 = vmatpush3.bf16.msra.mxu0 %v1902_v22  ;;  %1658 = vmatpush3.bf16.msra.mxu1 %v1903_v23 }
  0xc8   :  { %1637 = vmatprep.subr.bf16.mxu0 %v1904_v24  ;;  %1659 = vmatprep.subr.bf16.mxu1 %v1905_v25  ;;  %v1394_v25 = vand.u32 127, %v202_v40 }
  0xcb   :  { %1638 = vmatpush3.bf16.msra.mxu0 %v1906_v26  ;;  %1660 = vmatpush3.bf16.msra.mxu1 %v1907_v27 }
  0xcc   :  { %1639 = vmatprep.subr.bf16.mxu0 %v1908_v28  ;;  %1661 = vmatprep.subr.bf16.mxu1 %v1909_v29 }
  0xcf   :  { %1640 = vmatpush3.bf16.msra.mxu0 %v1910_v30  ;;  %1662 = vmatpush3.bf16.msra.mxu1 %v1911_v31 }
  0xd0   :  { %1641 = vmatprep.subr.bf16.mxu0 %v1912_v32  ;;  %1663 = vmatprep.subr.bf16.mxu1 %v1913_v33 }
  0xd3   :  { %1642 = vmatpush3.bf16.msra.mxu0 %v1914_v34  ;;  %1664 = vmatpush3.bf16.msra.mxu1 %v1915_v35 }
  0xd4   :  { %1643 = vmatprep.subr.bf16.mxu0 %v1916_v36  ;;  %1665 = vmatprep.subr.bf16.mxu1 %v1917_v37 }
  0xd7   :  { %1644 = vmatpush3.bf16.msra.mxu0 %v1918_v38  ;;  %1666 = vmatpush3.bf16.msra.mxu1 %v1919_v39 }
 0x18d   :  { %v937_v51 = vpop.f32.mrb[0].mxu0  ;;  %v1019_v52 = vpop.f32.mrb[0].mxu1 }
 0x18e   :  { %v1673_v53 = vadd.f32 %v937_v51, %v205_v47  ;;  %v1675_v54 = vadd.f32 %v1019_v52, %v213_v48  ;;  %v939_v55 = vpop.f32.mrb[1].mxu0  ;;  %v1021_v56 = vpop.f32.mrb[1].mxu1 }
 0x18f   :  { %v1674_v57 = vadd.f32 %v939_v55, %v209_v49  ;;  %v1676_v58 = vadd.f32 %v1021_v56, %v217_v50  ;;  %v941_v59 = vpop.f32.mrb[2].mxu0  ;;  %v1023_v60 = vpop.f32.mrb[2].mxu1 }
 0x190   :  { %1026 = vst [vmem:[#allocation8] sm:$0xff] %v1673_v53  ;;  %v1030_v61 = vmul.f32 %v1673_v53, %v1673_v53  ;;  %1028 = vst [vmem:[#allocation8 + $0x10] sm:$0xff] %v1675_v54  ;;  %v942_v62 = vpop.f32.mrb[3].mxu0  ;;  %v1024_v63 = vpop.f32.mrb[3].mxu1  ;;  %v1041_v3 = vpack.c.bf16 %v1673_v53, %v1673_v53  ;;  %v1043_v4 = vpack.c.bf16 %v1675_v54, %v1675_v54 }
 0x191   :  { %1027 = vst [vmem:[#allocation8 + $0x8] sm:$0xff] %v1674_v57  ;;  %v1031_v0 = vmul.f32 %v1674_v57, %v1674_v57  ;;  %1029 = vst [vmem:[#allocation8 + $0x18] sm:$0xff] %v1676_v58  ;;  %v1042_v1 = vpack.c.bf16 %v1674_v57, %v1674_v57  ;;  %v1044_v2 = vpack.c.bf16 %v1676_v58, %v1676_v58 }
 0x192   :  { %v1032_v5 = vmul.f32 %v1675_v54, %v1675_v54  ;;  %v1033_v7 = vmul.f32 %v1676_v58, %v1676_v58 }
 0x193   :  { %1333 = vmatprep.mubr.bf16.mxu0 %v1042_v1  ;;  %1373 = vmatprep.mubr.bf16.mxu1 %v1044_v2  ;;  %v1034_v6 = vadd.f32 %v1031_v0, %v1030_v61 }
 0x194   :  { %1334 = vmatmul.mubr.bf16.vlgmr.msra.gmra.mrb[4].mxu0 %v1041_v3  ;;  %1374 = vmatmul.mubr.bf16.vlgmr.msra.gmra.mrb[4].mxu1 %v1043_v4 }
 0x195   :  { %v1035_v8 = vadd.f32 %v1034_v6, %v1032_v5 }
 0x197   :  { %v1036_v9 = vadd.f32 %v1035_v8, %v1033_v7 }
 0x199   :  { %1037 = vadd.xlane.f32.xlu0 %v1036_v9 }
 0x226   :  { %v1038_v10 = vpop.xlane.xlu0 %1037 }
 0x227   :  { %v1039_v11 = vmax.f32 %v1038_v10, 1e-24 }
 0x229   :  { %1920 = vrsqrt.f32 %v1039_v11 }
 0x233   :  { %v1921_v23 = vpop.eup %1920 }
 0x267   :  { %v1645_v12 = vpop.f32.mrb[4].mxu0  ;;  %v1667_v13 = vpop.f32.mrb[4].mxu1 }
 0x268   :  { %v1646_v14 = vpop.f32.mrb[5].mxu0  ;;  %v1668_v15 = vpop.f32.mrb[5].mxu1 }
 0x269   :  { %v1647_v16 = vadd.f32 %v1646_v14, %v1645_v12  ;;  %v1669_v17 = vadd.f32 %v1668_v15, %v1667_v13  ;;  %v1648_v18 = vpop.f32.mrb[6].mxu0  ;;  %v1670_v19 = vpop.f32.mrb[6].mxu1 }
 0x26a   :  { %v1649_v20 = vpop.f32.mrb[7].mxu0  ;;  %v1671_v21 = vpop.f32.mrb[7].mxu1 }
 0x26b   :  { %v1376_v22 = vadd.f32 %v1669_v17, %v1647_v16 }
 0x26d   :  { %v1381_v24 = vmul.f32 %v1921_v23, %v1376_v22 }
 0x26f   :  { %1382 = vst [vmem:[#allocation9] sm:$0xff] %v1381_v24  ;;  %1383 = vmax.xlane.f32.xlu0 %v1381_v24 }
 0x2fc   :  { %v1384_v26 = vpop.xlane.xlu0 %1383 }
 0x2fd   :  { %v1385_v27 = vsub.f32 %v1381_v24, %v1384_v26  ;;  %vm1395_vm0 = vcmp.eq.f32.partialorder %v1381_v24, %v1384_v26 }
 0x2fe   :  { %v1396_v28 = vsel %vm1395_vm0, %v1394_v25, 128 }
 0x2ff   :  { %v1386_v29 = vmul.f32 1.442695, %v1385_v27  ;;  %v1398_v30 = vshra.s32 %v1396_v28, 16  ;;  %v1397_v33 = vand.u32 65535, %v1396_v28 }
 0x301   :  { %1922 = vpow2.f32 %v1386_v29  ;;  %v1400_v31 = vcvt.s32.f32 %v1398_v30  ;;  %v1399_v35 = vcvt.s32.f32 %v1397_v33 }
 0x303   :  { %1401 = vmin.xlane.f32.xlu1 %v1400_v31 }
 0x30b   :  { %v1923_v32 = vpop.eup %1922 }
 0x30c   :  { %1388 = vadd.xlane.f32.xlu1 %v1923_v32 }
 0x390   :  { %v1402_v34 = vpop.xlane.xlu1 %1401 }
 0x391   :  { %vm1403_vm1 = vcmp.eq.f32.partialorder %v1400_v31, %v1402_v34 }
 0x392   :  { %v1404_v36 = vsel %vm1403_vm1, %v1399_v35, inf }
 0x393   :  { %1405 = vmin.xlane.f32.xlu0 %v1404_v36 }
 0x399   :  { %v1389_v37 = vpop.xlane.xlu1 %1388 }
 0x39a   :  { %1924 = vrcp.f32 %v1389_v37 }
 0x3a4   :  { %v1925_v38 = vpop.eup %1924 }
 0x3a5   :  { %2003 = shalt.err (!%p2000_p0)
}
 0x3a6   :  { %s2004_s23 = scalar_lea.hbm %s2233_s5, 128 }
 0x3a7   :  { %p2005_p1 = scmp.ne.s32.totalorder %s2233_s5, %s2004_s23  ;;  %p2008_p2 = scmp.lt.u32.totalorder %s2004_s23, %s2233_s5 }
 0x3a9   :  { %p2010_p3 = pnand %p2008_p2, %p2005_p1 }
 0x3ab   :  { %2013 = shalt.err (!%p2010_p3)
}
 0x3ac   :  { %1431 = dma.vmem_to_hbm [thread:$0]  %s1429_s17, 128, %s2233_s5, [#allocation10]   ;;  %v1391_v39 = vmul.f32 %v1925_v38, %v1923_v32 }
 0x3ad   :  { %s2014_s29 = scalar_lea.vmem %s1419_s19, 512  ;;  %p2019_p5 = scmp.lt.s32.totalorder %s1419_s19, %s1419_s19 }
 0x3ae   :  { %p2015_p4 = scmp.ne.s32.totalorder %s1419_s19, %s2014_s29  ;;  %p2020_p6 = scmp.lt.s32.totalorder %s2014_s29, %s2014_s29 }
 0x3b0   :  { %p2021_p7 = por %p2020_p6, %p2019_p5 }
 0x3b2   :  { %p2022_p8 = pnand %p2021_p7, %p2015_p4 }
 0x3b4   :  { %2025 = shalt.err (!%p2022_p8)
}
 0x3b5   :  { %s2026_s9 = scalar_lea.hbm %s2232_s4, 512 }
 0x3b6   :  { %p2027_p9 = scmp.ne.s32.totalorder %s2232_s4, %s2026_s9  ;;  %p2030_p10 = scmp.lt.u32.totalorder %s2026_s9, %s2232_s4 }
 0x3b8   :  { %p2032_p11 = pnand %p2030_p10, %p2027_p9 }
 0x3ba   :  { %2035 = shalt.err (!%p2032_p11)
}
 0x3bb   :  { %1421 = dma.vmem_to_hbm [thread:$0]  %s1419_s19, 512, %s2232_s4, [#allocation4]   ;;  %1392 = vst [vmem:[#allocation11] sm:$0xff] %v1391_v39 }
 0x3bc   :  { %s2099_s14 = smov [#allocation11]  }
 0x3bd   :  { %s1438_s15 = sshll.u32 %s2099_s14, 4  ;;  %s1439_s15 = int_to_ptr.vmem [resolvable:$true] %s1438_s15 }
 0x3be   :  { %s2036_s3 = scalar_lea.vmem %s1439_s15, 128  ;;  %p2041_p13 = scmp.lt.s32.totalorder %s1439_s15, %s1439_s15 }
 0x3bf   :  { %p2037_p12 = scmp.ne.s32.totalorder %s1439_s15, %s2036_s3  ;;  %p2042_p0 = scmp.lt.s32.totalorder %s2036_s3, %s2036_s3 }
 0x3c1   :  { %p2043_p1 = por %p2042_p0, %p2041_p13 }
 0x3c3   :  { %p2044_p2 = pnand %p2043_p1, %p2037_p12 }
 0x3c5   :  { %2047 = shalt.err (!%p2044_p2)
}
 0x3c6   :  { %s2048_s17 = scalar_lea.hbm %s2234_s6, 128 }
 0x3c7   :  { %p2049_p3 = scmp.ne.s32.totalorder %s2234_s6, %s2048_s17  ;;  %p2052_p4 = scmp.lt.u32.totalorder %s2048_s17, %s2234_s6 }
 0x3c9   :  { %p2054_p5 = pnand %p2052_p4, %p2049_p3 }
 0x3cb   :  { %2057 = shalt.err (!%p2054_p5)
}
 0x3cc   :  { %1441 = dma.vmem_to_hbm [thread:$0]  %s1439_s15, 128, %s2234_s6, [#allocation10]   ;;  %v1408_v40 = vcvt.f32.s32 %v1402_v34 }
 0x3cd   :  { %s2100_s23 = smov [#allocation12]  }
 0x3ce   :  { %s1448_s24 = sshll.u32 %s2100_s23, 4  ;;  %v1409_v42 = vshll.u32 %v1408_v40, 16  ;;  %s1449_s24 = int_to_ptr.vmem [resolvable:$true] %s1448_s24 }
 0x3cf   :  { %s2058_s26 = scalar_lea.vmem %s1449_s24, 128  ;;  %p2063_p7 = scmp.lt.s32.totalorder %s1449_s24, %s1449_s24 }
 0x3d0   :  { %p2059_p6 = scmp.ne.s32.totalorder %s1449_s24, %s2058_s26  ;;  %p2064_p8 = scmp.lt.s32.totalorder %s2058_s26, %s2058_s26 }
 0x3d2   :  { %p2065_p9 = por %p2064_p8, %p2063_p7 }
 0x3d4   :  { %p2066_p10 = pnand %p2065_p9, %p2059_p6 }
 0x420   :  { %v1406_v41 = vpop.xlane.xlu0 %1405 }
 0x421   :  { %v1407_v43 = vcvt.f32.s32 %v1406_v41 }
 0x423   :  { %v1410_v44 = vadd.s32 %v1409_v42, %v1407_v43 }
 0x425   :  { %1411 = vst [vmem:[#allocation12] sm:$0xff] %v1410_v44 }
 0x426   :  { %2069 = shalt.err (!%p2066_p10)
}
 0x427   :  { %s2070_s6 = scalar_lea.hbm %s2235_s7, 128 }
 0x428   :  { %p2071_p11 = scmp.ne.s32.totalorder %s2235_s7, %s2070_s6  ;;  %p2074_p12 = scmp.lt.u32.totalorder %s2070_s6, %s2235_s7 }
 0x42a   :  { %p2076_p13 = pnand %p2074_p12, %p2071_p11 }
 0x42c   :  { %2079 = shalt.err (!%p2076_p13)
}
 0x42d   :  { %1451 = dma.vmem_to_hbm [thread:$0]  %s1449_s24, 128, %s2235_s7, [#allocation13]  }
 0x42e   :  { %2084 = dma.done.wait [#allocation4], 512  }
 0x42f   :  { %2085 = vsyncadd [#allocation4], 4294966784 }
 0x430   :  { %2086 = dma.done.wait [#allocation10], 256  }
 0x431   :  { %2087 = vsyncadd [#allocation10], 4294967040 }
 0x432   :  { %2088 = dma.done.wait [#allocation13], 128  }
 0x433   :  { %2089 = vsyncadd [#allocation13], 4294967168 }
 0x434   :  { %1464 = vsyncpa [#allocation3], 1 }
 0x435   :  { %1465 = vsyncpa [#allocation6], 1 }
 0x436   :  { %1466 = vsyncpa [#allocation4], 1 }
 0x437   :  { %1467 = vsyncpa [#allocation10], 1 }
 0x438   :  { %1468 = vsyncpa [#allocation13], 1 }

</bundles_post_ra>
